<compile_context>
chip_gen: v7x
topology: tpu7x:2x2x1
jax: 0.10.0
libtpu: 0.0.40
codegen_flags: <defaults>
</compile_context>

<pallas_src>
import jax
import jax.numpy as jnp
from jax.experimental import pallas as pl
from jax.experimental.pallas import tpu as pltpu

HIDDEN = 500
OUT = 20
HIDDEN_PAD = 512      # lane-dense hidden width (multiple of 128)
OUT_PAD = 128         # lane-dense output width (multiple of 128)
DEFAULT_TILE_B = 256  # MXU-height-friendly batch tile (v6e/v7x 2x256^2 MXU)


def _round_up(n, m):
    return ((n + m - 1) // m) * m


def mlp_kernel(x_ref, w1_ref, b1_ref, w2_ref, b2_ref, o_ref):
    # Two MXU matmuls per batch tile, fully VMEM-resident. Accumulate in f32;
    # bias-add / ReLU run in f32 on the VPU.
    h = jnp.dot(x_ref[...], w1_ref[...], preferred_element_type=jnp.float32)
    h = jnp.maximum(h + b1_ref[...], 0.0)                       # (TILE_B, 512) f32
    y = jnp.dot(h.astype(w2_ref.dtype), w2_ref[...],
                preferred_element_type=jnp.float32)             # (TILE_B, 128) f32
    o_ref[...] = (y + b2_ref[...]).astype(o_ref.dtype)


def pad_params(w1, b1, w2, b2, compute_dtype=jnp.float32):
    """Zero-pad to lane-dense shapes; weights cast to compute_dtype, biases stay f32."""
    feat = w1.shape[0]
    assert w1.shape == (feat, HIDDEN) and w2.shape == (HIDDEN, OUT)
    b1 = jnp.reshape(b1, (1, HIDDEN))
    b2 = jnp.reshape(b2, (1, OUT))
    w1p = jnp.zeros((feat, HIDDEN_PAD), compute_dtype).at[:, :HIDDEN].set(
        w1.astype(compute_dtype))
    b1p = jnp.zeros((1, HIDDEN_PAD), jnp.float32).at[:, :HIDDEN].set(
        b1.astype(jnp.float32))
    w2p = jnp.zeros((HIDDEN_PAD, OUT_PAD), compute_dtype).at[:HIDDEN, :OUT].set(
        w2.astype(compute_dtype))
    b2p = jnp.zeros((1, OUT_PAD), jnp.float32).at[:, :OUT].set(
        b2.astype(jnp.float32))
    return w1p, b1p, w2p, b2p


def net_forward(x, w1p, b1p, w2p, b2p, tile_b=None):
    """x: (B, F) f32. Padded params from pad_params(). Returns (B, 20) f32."""
    B, F = x.shape
    assert w1p.shape == (F, HIDDEN_PAD)
    assert b1p.shape == (1, HIDDEN_PAD)
    assert w2p.shape == (HIDDEN_PAD, OUT_PAD)
    assert b2p.shape == (1, OUT_PAD)

    if tile_b is None:
        tile_b = min(DEFAULT_TILE_B, _round_up(B, 8))
    b_pad = _round_up(B, tile_b)

    xp = x.astype(w1p.dtype)
    if b_pad != B:
        xp = jnp.pad(xp, ((0, b_pad - B), (0, 0)))

    grid = (b_pad // tile_b,)
    out = pl.pallas_call(
        mlp_kernel,
        out_shape=jax.ShapeDtypeStruct((b_pad, OUT_PAD), jnp.float32),
        grid=grid,
        in_specs=[
            pl.BlockSpec((tile_b, F), lambda i: (i, 0)),          # x: per-tile
            pl.BlockSpec((F, HIDDEN_PAD), lambda i: (0, 0)),      # W1: VMEM-resident
            pl.BlockSpec((1, HIDDEN_PAD), lambda i: (0, 0)),      # b1: VMEM-resident
            pl.BlockSpec((HIDDEN_PAD, OUT_PAD), lambda i: (0, 0)),  # W2: VMEM-resident
            pl.BlockSpec((1, OUT_PAD), lambda i: (0, 0)),         # b2: VMEM-resident
        ],
        out_specs=pl.BlockSpec((tile_b, OUT_PAD), lambda i: (i, 0)),
        compiler_params=pltpu.CompilerParams(
            dimension_semantics=("parallel",)),                   # v7x megacore split
    )(xp, w1p, b1p, w2p, b2p)
    return out[:B, :OUT]


def init_params(key, feature_num):
    # Deterministic init mimicking PyTorch nn.Linear default:
    # uniform(-1/sqrt(fan_in), 1/sqrt(fan_in)) for both weight and bias.
    k1, k2, k3, k4 = jax.random.split(key, 4)
    bound1 = 1.0 / jnp.sqrt(jnp.float32(feature_num))
    bound2 = 1.0 / jnp.sqrt(jnp.float32(HIDDEN))
    w1 = jax.random.uniform(k1, (feature_num, HIDDEN), jnp.float32, -bound1, bound1)
    b1 = jax.random.uniform(k2, (1, HIDDEN), jnp.float32, -bound1, bound1)
    w2 = jax.random.uniform(k3, (HIDDEN, OUT), jnp.float32, -bound2, bound2)
    b2 = jax.random.uniform(k4, (1, OUT), jnp.float32, -bound2, bound2)
    return w1, b1, w2, b2


if __name__ == "__main__":
    FEATURE_NUM = 32
    BATCH = 300          # ragged vs tile_b=128 -> exercises pad + multi-step grid (3 tiles)
    TILE_B = 128

    key = jax.random.PRNGKey(0)
    kx, kp = jax.random.split(key)
    x = jax.random.normal(kx, (BATCH, FEATURE_NUM), jnp.float32)
    w1, b1, w2, b2 = init_params(kp, FEATURE_NUM)

    # Pure-JAX reference (same math as the PyTorch module).
    ref = jnp.maximum(x @ w1 + b1, 0.0) @ w2 + b2

    # --- f32 path: tight correctness check ---
    p32 = pad_params(w1, b1, w2, b2, jnp.float32)
    out32 = net_forward(x, *p32, tile_b=TILE_B)
    jax.block_until_ready(out32)
    assert out32.shape == (BATCH, OUT)
    assert jnp.allclose(out32, ref, atol=1e-4, rtol=1e-4)

    # --- bf16 weight/activation path (fast MXU rate on v6e/v7x), f32 accumulate ---
    pbf16 = pad_params(w1, b1, w2, b2, jnp.bfloat16)
    outbf = net_forward(x, *pbf16, tile_b=TILE_B)
    jax.block_until_ready(outbf)
    assert outbf.shape == (BATCH, OUT)
    assert jnp.allclose(outbf, ref, atol=5e-2, rtol=5e-2)

    print("KERNEL_OK")
</pallas_src>

<mosaic_0001>
module attributes {stable_mosaic.version = 11 : i64} {
  func.func @mlp_kernel(%arg0: i32, %arg1: memref<128x32xf32, #tpu.memory_space<vmem>>, %arg2: memref<32x512xf32, #tpu.memory_space<vmem>>, %arg3: memref<1x512xf32, #tpu.memory_space<vmem>>, %arg4: memref<512x128xf32, #tpu.memory_space<vmem>>, %arg5: memref<1x128xf32, #tpu.memory_space<vmem>>, %arg6: memref<128x128xf32, #tpu.memory_space<vmem>>) attributes {dimension_semantics = [#tpu.dimension_semantics<parallel>], iteration_bounds = array<i64: 3>, scalar_prefetch = 0 : i64, scratch_operands = 0 : i64, tpu.core_type = #tpu.core_type<tc>, window_params = [{transform_indices = @transform_0, window_bounds = array<i64: 128, 32>}, {pipeline_mode = #tpu.pipeline_mode<synchronous>, transform_indices = @transform_1, window_bounds = array<i64: 32, 512>}, {pipeline_mode = #tpu.pipeline_mode<synchronous>, transform_indices = @transform_2, window_bounds = array<i64: 1, 512>}, {pipeline_mode = #tpu.pipeline_mode<synchronous>, transform_indices = @transform_3, window_bounds = array<i64: 512, 128>}, {pipeline_mode = #tpu.pipeline_mode<synchronous>, transform_indices = @transform_4, window_bounds = array<i64: 1, 128>}, {transform_indices = @transform_5, window_bounds = array<i64: 128, 128>}]} {
    %c0 = arith.constant 0 : index
    %c0_0 = arith.constant 0 : index
    %0 = vector.load %arg1[%c0, %c0_0] : memref<128x32xf32, #tpu.memory_space<vmem>>, vector<128x32xf32>
    %c0_1 = arith.constant 0 : index
    %c0_2 = arith.constant 0 : index
    %1 = vector.load %arg2[%c0_1, %c0_2] : memref<32x512xf32, #tpu.memory_space<vmem>>, vector<32x512xf32>
    %cst = arith.constant dense<0.000000e+00> : vector<128x512xf32>
    %2 = tpu.matmul %0, %1, %cst {dimension_numbers = #tpu.dot_dimension_numbers<[1], [0], [0], [1], [0, 0, 1, 1], [], []>} : vector<128x32xf32>, vector<32x512xf32>, vector<128x512xf32> -> vector<128x512xf32>
    %c0_3 = arith.constant 0 : index
    %c0_4 = arith.constant 0 : index
    %3 = vector.load %arg3[%c0_3, %c0_4] : memref<1x512xf32, #tpu.memory_space<vmem>>, vector<1x512xf32>
    %4 = vector.broadcast %3 : vector<1x512xf32> to vector<128x512xf32>
    %5 = arith.addf %2, %4 : vector<128x512xf32>
    %cst_5 = arith.constant 0.000000e+00 : f32
    %6 = vector.broadcast %cst_5 : f32 to vector<128x512xf32>
    %7 = arith.maximumf %5, %6 : vector<128x512xf32>
    %c0_6 = arith.constant 0 : index
    %c0_7 = arith.constant 0 : index
    %8 = vector.load %arg4[%c0_6, %c0_7] : memref<512x128xf32, #tpu.memory_space<vmem>>, vector<512x128xf32>
    %cst_8 = arith.constant dense<0.000000e+00> : vector<128x128xf32>
    %9 = tpu.matmul %7, %8, %cst_8 {dimension_numbers = #tpu.dot_dimension_numbers<[1], [0], [0], [1], [0, 0, 1, 1], [], []>} : vector<128x512xf32>, vector<512x128xf32>, vector<128x128xf32> -> vector<128x128xf32>
    %c0_9 = arith.constant 0 : index
    %c0_10 = arith.constant 0 : index
    %10 = vector.load %arg5[%c0_9, %c0_10] : memref<1x128xf32, #tpu.memory_space<vmem>>, vector<1x128xf32>
    %11 = vector.broadcast %10 : vector<1x128xf32> to vector<128x128xf32>
    %12 = arith.addf %9, %11 : vector<128x128xf32>
    %c0_11 = arith.constant 0 : index
    %c0_12 = arith.constant 0 : index
    %13 = vector.load %arg6[%c0_11, %c0_12] : memref<128x128xf32, #tpu.memory_space<vmem>>, vector<128x128xf32>
    tpu.vector_store %arg6[%c0_11, %c0_12], %12 {strides = array<i32>} : memref<128x128xf32, #tpu.memory_space<vmem>>, vector<128x128xf32>,
    return
  }
  func.func @transform_0(%arg0: i32) -> (i32, i32) {
    %c0_i32 = arith.constant 0 : i32
    %c0_i32_0 = arith.constant 0 : i32
    return %arg0, %c0_i32 : i32, i32
  }
  func.func @transform_1(%arg0: i32) -> (i32, i32) {
    %c0_i32 = arith.constant 0 : i32
    %c0_i32_0 = arith.constant 0 : i32
    %c0_i32_1 = arith.constant 0 : i32
    return %c0_i32, %c0_i32_0 : i32, i32
  }
  func.func @transform_2(%arg0: i32) -> (i32, i32) {
    %c0_i32 = arith.constant 0 : i32
    %c0_i32_0 = arith.constant 0 : i32
    %c0_i32_1 = arith.constant 0 : i32
    return %c0_i32, %c0_i32_0 : i32, i32
  }
  func.func @transform_3(%arg0: i32) -> (i32, i32) {
    %c0_i32 = arith.constant 0 : i32
    %c0_i32_0 = arith.constant 0 : i32
    %c0_i32_1 = arith.constant 0 : i32
    return %c0_i32, %c0_i32_0 : i32, i32
  }
  func.func @transform_4(%arg0: i32) -> (i32, i32) {
    %c0_i32 = arith.constant 0 : i32
    %c0_i32_0 = arith.constant 0 : i32
    %c0_i32_1 = arith.constant 0 : i32
    return %c0_i32, %c0_i32_0 : i32, i32
  }
  func.func @transform_5(%arg0: i32) -> (i32, i32) {
    %c0_i32 = arith.constant 0 : i32
    %c0_i32_0 = arith.constant 0 : i32
    return %arg0, %c0_i32 : i32, i32
  }
}

</mosaic_0001>

<bundles_post_ra>
// kernel: tpu_custom_call.1
= control target key start
LH: loop header
LB: loop body
LE: loop exit
PB: predicated region body
PF: predicated region fallthrough
CT: control target
= control target key end

     0   :  { %10 = vsyncpa [#allocation3], 0  ;;  %s2060_s0 = inlined_call_operand.vmem [shape: f32[384,32], index: 0, kind: input, shape index: {}]   ;;  %s2061_s1 = inlined_call_operand.vmem [shape: f32[32,512], index: 1, kind: input, shape index: {}]   ;;  %s2062_s2 = inlined_call_operand.vmem [shape: f32[1,512], index: 2, kind: input, shape index: {}]   ;;  %s2063_s3 = inlined_call_operand.hbm [shape: f32[512,128], index: 3, kind: input, shape index: {}]   ;;  %s2064_s4 = inlined_call_operand.vmem [shape: f32[1,128], index: 4, kind: input, shape index: {}]   ;;  %s2065_s5 = inlined_call_operand.hbm [shape: f32[384,128], index: 5, kind: output, shape index: {}]  }
   0x1   :  { %11 = vsyncpa [#allocation4], 0 }
   0x2   :  { %13 = vsyncpa [#allocation4 + $0x1], 0  ;;  %s1671_s18 = smov 0   ;;  %s1673_s19 = smov 0  }
   0x3   :  { %s1675_s20 = smov 0   ;;  %s1677_s21 = smov 0  }
   0x4 LB: > { %s1692_s22 = sadd.s32 4294967295, %s1632_s21   ;;  %s1195_s23 = sadd.s32 4294967294, %s1632_s21   ;;  %s1632_s21 = sphi %s1677_s21, %s2081_s21   ;;  %s1628_s20 = sphi %s1675_s20, %s2080_s20   ;;  %s1624_s19 = sphi %s1673_s19, %s2079_s19   ;;  %s1620_s18 = sphi %s1671_s18, %s2078_s18  }
   0x5   : > { %s1696_s24 = sadd.s32 1, %s1632_s21   ;;  %s136_s25 = sadd.s32 1, %s1628_s20 }
   0x6   : > { %s133_s26 = ssub.s32 %s1632_s21, %s1696_s24  ;;  %p146_p0 = scmp.ne.s32.totalorder %s1628_s20, %s1624_s19 }
   0x7   : > { %p134_p1 = scmp.eq.s32.totalorder %s133_s26, 0  ;;  %p147_p2 = scmp.eq.s32.totalorder %s1692_s22, 2 }
   0x8   : > { %p152_p3 = scmp.ne.s32.totalorder %s1624_s19, %s1620_s18  ;;  %p153_p4 = scmp.eq.s32.totalorder %s1195_s23, 2 }
   0x9   : > { %s1707_s27 = scalar_select %p134_p1, %s1628_s20, %s136_s25  }
   0xa   : > { %p1709_p5 = por %p147_p2, %p146_p0  ;;  %p1713_p6 = por %p153_p4, %p152_p3 }
   0xb   : > { %p1196_p7 = scmp.ge.s32.totalorder %s1632_s21, 1  ;;  %p160_p8 = scmp.lt.s32.totalorder %s1632_s21, 4 }
   0xc   : > { %s2069_s28 = scalar_select %p1709_p5, 1, 0 }
   0xd   : > { %s2070_s29 = scalar_select %p1713_p6, 1, 0 }
   0xe   : > { %p2066_p9 = scmp.eq.s32.totalorder %s1692_s22, 0  ;;  %p1720_p10 = pnand %p1196_p7, %p160_p8 }
   0xf   : > { %s1634_s6 = smov [#allocation2]   ;;  %s1538_s11 = scalar_lea.hbm %s2063_s3, 8192 }
  0x10   : > { %s2071_s30 = scalar_select %p1720_p10, 1, 0 }
  0x11   : > { %s178_s7 = sshll.u32 %s1634_s6, 4  ;;  %p1489_p11 = pneg %p1720_p10  ;;  %s179_s7 = int_to_ptr.vmem [resolvable:$true] %s178_s7 }
  0x12   : > { %p1539_p13 = scmp.ne.s32.totalorder %s2063_s3, %s1538_s11  ;;  %p1545_p3 = scmp.lt.u32.totalorder %s1538_s11, %s2063_s3 }
  0x13   : > { %p1728_p12 = pnand %p2066_p9, %p1489_p11 }
  0x15   : > { %p1540_p0 = pneg %p1728_p12 }
  0x17   : > { %p1541_p1 = pnand %p1540_p0, %p1539_p13 }
  0x19   : > { %p1542_p2 = pneg %p1541_p1 }
  0x1b   : > { %p1547_p4 = pnand %p1545_p3, %p1542_p2 }
  0x1d   : > { %1550 = shalt.err (!%p1547_p4)
}
  0x1e   : > { %s1551_s16 = scalar_lea.vmem %s179_s7, 8192  ;;  %p1559_p9 = scmp.lt.s32.totalorder %s179_s7, %s179_s7 }
  0x1f   : > { %p1552_p7 = scmp.ne.s32.totalorder %s179_s7, %s1551_s16  ;;  %p1560_p6 = scmp.lt.s32.totalorder %s1551_s16, %s1551_s16 }
  0x21   : > { %p1554_p8 = pnand %p1552_p7, %p1540_p0  ;;  %p1561_p5 = por %p1560_p6, %p1559_p9 }
  0x23   : > { %p1555_p11 = pneg %p1554_p8 }
  0x25   : > { %p1562_p10 = pnand %p1561_p5, %p1555_p11 }
  0x27   : > { %1565 = shalt.err (!%p1562_p10)
}
  0x28   : > { %s1635_s17 = smov 128   ;;  %s1636_s23 = smov 8  }
  0x29   : > { %1492 = dma.hbm_to_vmem [thread:$0]  (!%p1728_p12), %s2063_s3, 8192, %s179_s7, [#allocation3], %s1635_s17, %s1635_s17, %s1636_s23  }
  0x2a   : > { %p2073_p13 = scmp.ne.s32.totalorder %s2071_s30, 0 }
  0x2b   : > { %p2074_p1 = scmp.eq.s32.totalorder (!%p2073_p13), %s1692_s22, 0 }
  0x2c   : > { %206 = sbr.rel (%p2073_p13) target bundleno = 576 (0x240), region = 40 }
  0x33   : > { %1611 = dma.done.wait (%p2074_p1), [#allocation3], 8192   ;;  %p2075_p0 = pmov %p2074_p1 }
  0x34   : > { %s1202_s6 = sshll.u32 %s1692_s22, 4  ;;  %v1637_v0 = vmov 0.0   ;;  %v258_v1 = vld [vmem:[%s2061_s1 + $0x8] sm:$0xff]  ;;  %v260_v3 = vld [vmem:[%s2061_s1 + $0x18] sm:$0xff]  ;;  %v257_v6 = vld [vmem:[%s2061_s1] sm:$0xff]  ;;  %vm295_vm0 = vcmask 261120  }
  0x35   : > { %1613 = vsyncadd (%p2075_p0), [#allocation3], 4294959104  ;;  %408 = vmatprep.mubr.f32.mxu0 %v1637_v0  ;;  %569 = vmatprep.mubr.f32.mxu1 %v1637_v0  ;;  %p235_p5 = scmp.lt.s32.totalorder %s1202_s6, 47  ;;  %v262_v2 = vld [vmem:[%s2061_s1 + $0x28] sm:$0xff]  ;;  %v264_v5 = vld [vmem:[%s2061_s1 + $0x38] sm:$0xff]  ;;  %s231_s13 = sand.u32 1, %s1624_s19  }
  0x36   : > { %v1403_v4 = vpack.c.bf16 %v262_v2, %v258_v1  ;;  %v261_v7 = vld [vmem:[%s2061_s1 + $0x20] sm:$0xff]  ;;  %v1411_v8 = vpack.c.bf16 %v264_v5, %v260_v3  ;;  %v259_v10 = vld [vmem:[%s2061_s1 + $0x10] sm:$0xff]  ;;  %v266_v12 = vld [vmem:[%s2061_s1 + $0x48] sm:$0xff]  ;;  %s1201_s16 = sshll.u32 %s231_s13, 7  ;;  %s1242_s17 = sshll.u32 %s1692_s22, 11 }
  0x37   : > { %s2083_s6 = smov (!%p235_p5, %s1202_s6), 47  ;;  %v1405_v9 = vpack.c.bf16 %v261_v7, %v257_v6  ;;  %v263_v11 = vld [vmem:[%s2061_s1 + $0x30] sm:$0xff]  ;;  %v270_v14 = vld [vmem:[%s2061_s1 + $0x68] sm:$0xff]  ;;  %v268_v15 = vld [vmem:[%s2061_s1 + $0x58] sm:$0xff]  ;;  %s2012_s7 = scalar_lea.hbm %s2065_s5, %s1242_s17 }
  0x38   : > { %s1203_s9 = sshll.u32 %s2083_s6, 3  ;;  %1404 = vmatprep.subr.bf16.mxu0 %v1403_v4  ;;  %v1413_v13 = vpack.c.bf16 %v263_v11, %v259_v10  ;;  %v272_v16 = vld [vmem:[%s2061_s1 + $0x78] sm:$0xff]  ;;  %1412 = vmatprep.subr.bf16.mxu1 %v1411_v8  ;;  %v1407_v17 = vpack.c.bf16 %v270_v14, %v266_v12  ;;  %v265_v19 = vld [vmem:[%s2061_s1 + $0x40] sm:$0xff]  ;;  %v267_v21 = vld [vmem:[%s2061_s1 + $0x50] sm:$0xff]  ;;  %s1975_s6 = scalar_lea.vmem [#allocation5], %s1201_s16 }
  0x39   : > { %1406 = vmatpush1.bf16.msra.mxu0 %v1405_v9  ;;  %v1415_v18 = vpack.c.bf16 %v272_v16, %v268_v15  ;;  %v269_v20 = vld [vmem:[%s2061_s1 + $0x60] sm:$0xff]  ;;  %v271_v23 = vld [vmem:[%s2061_s1 + $0x70] sm:$0xff]  ;;  %s1811_s11 = scalar_lea.vmem %s2060_s0, %s1203_s9  ;;  %v747_v28 = vld [vmem:[#allocation2 + $0x88] sm:$0xff]  ;;  %s1121_s23 = sshll.u32 %s1975_s6, 4  ;;  %s2014_s23 = int_to_ptr.vmem [resolvable:$true] %s1121_s23 }
  0x3a   : > { %1414 = vmatpush1.bf16.msra.mxu1 %v1413_v13  ;;  %v1409_v22 = vpack.c.bf16 %v269_v20, %v265_v19  ;;  %1408 = vmatprep.subr.bf16.mxu0 %v1407_v17  ;;  %v1417_v24 = vpack.c.bf16 %v271_v23, %v267_v21  ;;  %v241_v25 = vld [vmem:[%s1811_s11] sm:$0xff]  ;;  %v242_v26 = vld [vmem:[%s1811_s11 + $0x8] sm:$0xff]  ;;  %v748_v38 = vld [vmem:[#allocation2 + $0x90] sm:$0xff]  ;;  %s2019_s8 = scalar_lea.sflag [#allocation4], %s231_s13  ;;  %s1566_s22 = scalar_lea.vmem %s2014_s23, 2048 }
  0x3b   : > { %1416 = vmatprep.subr.bf16.mxu1 %v1415_v18  ;;  %v746_v27 = vld [vmem:[#allocation2 + $0x80] sm:$0xff]  ;;  %v731_v30 = vld [vmem:[#allocation2 + $0x8] sm:$0xff]  ;;  %v749_v39 = vld [vmem:[#allocation2 + $0x98] sm:$0xff]  ;;  %p1567_p6 = scmp.ne.s32.totalorder %s2014_s23, %s1566_s22  ;;  %p2076_p9 = scmp.ne.s32.totalorder %s2069_s28, 0 }
  0x3c   : > { %v730_v29 = vld [vmem:[#allocation2] sm:$0xff]  ;;  %v1419_v31 = vpack.c.bf16 %v747_v28, %v746_v27  ;;  %v779_v33 = vld [vmem:[#allocation2 + $0x188] sm:$0xff]  ;;  %v1423_v41 = vpack.c.bf16 %v749_v39, %v748_v38  ;;  %v732_v42 = vld [vmem:[#allocation2 + $0x10] sm:$0xff]  ;;  %s1638_s30 = smov [#allocation5]  }
  0x3d   : > { %1410 = vmatpush1.bf16.msra.mxu0 %v1409_v22  ;;  %v778_v32 = vld [vmem:[#allocation2 + $0x180] sm:$0xff]  ;;  %v1421_v35 = vpack.c.bf16 %v731_v30, %v730_v29  ;;  %v763_v37 = vld [vmem:[#allocation2 + $0x108] sm:$0xff]  ;;  %v733_v43 = vld [vmem:[#allocation2 + $0x18] sm:$0xff]  ;;  %p1568_p10 = pnand %p1567_p6, %p2076_p9  ;;  %s1570_s10 = sshll.u32 %s1638_s30, 4  ;;  %s1571_s10 = int_to_ptr.vmem [resolvable:$false] %s1570_s10 }
  0x3e   : > { %1418 = vmatpush1.bf16.msra.mxu1 %v1417_v24  ;;  %v762_v34 = vld [vmem:[#allocation2 + $0x100] sm:$0xff]  ;;  %v1451_v36 = vpack.c.bf16 %v779_v33, %v778_v32  ;;  %1420 = vmatprep.subr.bf16.mxu0 %v1419_v31  ;;  %v780_v44 = vld [vmem:[#allocation2 + $0x190] sm:$0xff]  ;;  %v781_v45 = vld [vmem:[#allocation2 + $0x198] sm:$0xff]  ;;  %v1425_v52 = vpack.c.bf16 %v733_v43, %v732_v42  ;;  %p1573_p2 = scmp.lt.s32.totalorder %s2014_s23, %s1571_s10 }
  0x3f   : > { %v1453_v40 = vpack.c.bf16 %v763_v37, %v762_v34  ;;  %v764_v46 = vld [vmem:[#allocation2 + $0x110] sm:$0xff]  ;;  %v765_v47 = vld [vmem:[#allocation2 + $0x118] sm:$0xff]  ;;  %v1455_v49 = vpack.c.bf16 %v781_v45, %v780_v44  ;;  %v750_v50 = vld [vmem:[#allocation2 + $0xa0] sm:$0xff]  ;;  %p1569_p12 = pneg %p1568_p10 }
  0x40   : > { %1204 = vmatmul.mubr.msk.f32.vlgmr.msra.gmra.mrb[0].mxu0 %vm295_vm0, %v241_v25  ;;  %1452 = vmatprep.subr.bf16.mxu1 %v1451_v36  ;;  %v243_v48 = vld [vmem:[%s1811_s11 + $0x10] sm:$0xff]  ;;  %v751_v51 = vld [vmem:[#allocation2 + $0xa8] sm:$0xff]  ;;  %v782_v53 = vld [vmem:[#allocation2 + $0x1a0] sm:$0xff]  ;;  %v1457_v55 = vpack.c.bf16 %v765_v47, %v764_v46 }
  0x41   : > { %1220 = vmatmul.mubr.msk.f32.vlgmr.msra.gmra.mrb[0].mxu1 %vm295_vm0, %v241_v25  ;;  %414 = vmatprep.mubr.f32.mxu0 %v1637_v0  ;;  %v783_v54 = vld [vmem:[#allocation2 + $0x1a8] sm:$0xff]  ;;  %v1427_v56 = vpack.c.bf16 %v751_v51, %v750_v50  ;;  %v734_v57 = vld [vmem:[#allocation2 + $0x20] sm:$0xff]  ;;  %v752_v62 = vld [vmem:[#allocation2 + $0xb0] sm:$0xff] }
  0x42   : > { %575 = vmatprep.mubr.f32.mxu1 %v1637_v0  ;;  %1422 = vmatpush3.bf16.msra.mxu0 %v1421_v35  ;;  %v735_v58 = vld [vmem:[#allocation2 + $0x28] sm:$0xff]  ;;  %v766_v59 = vld [vmem:[#allocation2 + $0x120] sm:$0xff]  ;;  %v1459_v60 = vpack.c.bf16 %v783_v54, %v782_v53  ;;  %v753_v63 = vld [vmem:[#allocation2 + $0xb8] sm:$0xff] }
  0x43   : > { %1454 = vmatpush3.bf16.msra.mxu1 %v1453_v40  ;;  %1424 = vmatprep.subr.bf16.mxu0 %v1423_v41  ;;  %v767_v61 = vld [vmem:[#allocation2 + $0x128] sm:$0xff]  ;;  %v244_v1 = vld [vmem:[%s1811_s11 + $0x18] sm:$0xff]  ;;  %v784_v2 = vld [vmem:[#allocation2 + $0x1b0] sm:$0xff]  ;;  %v1429_v4 = vpack.c.bf16 %v735_v58, %v734_v57  ;;  %v1431_v6 = vpack.c.bf16 %v753_v63, %v752_v62 }
  0x44   : > { %1205 = vmatmul.mubr.msk.f32.gmra.mrb[2].mxu0 %vm295_vm0, %v242_v26  ;;  %1456 = vmatprep.subr.bf16.mxu1 %v1455_v49  ;;  %v785_v3 = vld [vmem:[#allocation2 + $0x1b8] sm:$0xff]  ;;  %v1461_v5 = vpack.c.bf16 %v767_v61, %v766_v59  ;;  %v736_v7 = vld [vmem:[#allocation2 + $0x30] sm:$0xff]  ;;  %v754_v12 = vld [vmem:[#allocation2 + $0xc0] sm:$0xff] }
  0x45   : > { %1221 = vmatmul.mubr.msk.f32.gmra.mrb[2].mxu1 %vm295_vm0, %v242_v26  ;;  %420 = vmatprep.mubr.f32.mxu0 %v1637_v0  ;;  %v737_v8 = vld [vmem:[#allocation2 + $0x38] sm:$0xff]  ;;  %v768_v9 = vld [vmem:[#allocation2 + $0x130] sm:$0xff]  ;;  %v1463_v10 = vpack.c.bf16 %v785_v3, %v784_v2  ;;  %v755_v13 = vld [vmem:[#allocation2 + $0xc8] sm:$0xff] }
  0x46   : > { %581 = vmatprep.mubr.f32.mxu1 %v1637_v0  ;;  %1426 = vmatpush3.bf16.msra.mxu0 %v1425_v52  ;;  %v769_v11 = vld [vmem:[#allocation2 + $0x138] sm:$0xff]  ;;  %v245_v14 = vld [vmem:[%s1811_s11 + $0x20] sm:$0xff]  ;;  %v787_v16 = vld [vmem:[#allocation2 + $0x1c8] sm:$0xff]  ;;  %v1433_v17 = vpack.c.bf16 %v737_v8, %v736_v7  ;;  %v1435_v19 = vpack.c.bf16 %v755_v13, %v754_v12 }
  0x47   : > { %1458 = vmatpush3.bf16.msra.mxu1 %v1457_v55  ;;  %1428 = vmatprep.subr.bf16.mxu0 %v1427_v56  ;;  %v786_v15 = vld [vmem:[#allocation2 + $0x1c0] sm:$0xff]  ;;  %v1465_v18 = vpack.c.bf16 %v769_v11, %v768_v9  ;;  %v739_v21 = vld [vmem:[#allocation2 + $0x48] sm:$0xff]  ;;  %v756_v25 = vld [vmem:[#allocation2 + $0xd0] sm:$0xff]  ;;  %v275_v11 = vlaneseq }
  0x48   : > { %1206 = vmatmul.mubr.msk.f32.gmra.mrb[4].mxu0 %vm295_vm0, %v243_v48  ;;  %1460 = vmatprep.subr.bf16.mxu1 %v1459_v60  ;;  %v738_v20 = vld [vmem:[#allocation2 + $0x40] sm:$0xff]  ;;  %v1467_v23 = vpack.c.bf16 %v787_v16, %v786_v15  ;;  %v771_v24 = vld [vmem:[#allocation2 + $0x148] sm:$0xff]  ;;  %v757_v26 = vld [vmem:[#allocation2 + $0xd8] sm:$0xff] }
  0x49   : > { %1222 = vmatmul.mubr.msk.f32.gmra.mrb[4].mxu1 %vm295_vm0, %v243_v48  ;;  %426 = vmatprep.mubr.f32.mxu0 %v1637_v0  ;;  %v770_v22 = vld [vmem:[#allocation2 + $0x140] sm:$0xff]  ;;  %v246_v27 = vld [vmem:[%s1811_s11 + $0x28] sm:$0xff]  ;;  %v788_v28 = vld [vmem:[#allocation2 + $0x1d0] sm:$0xff]  ;;  %v1437_v30 = vpack.c.bf16 %v739_v21, %v738_v20  ;;  %v1439_v32 = vpack.c.bf16 %v757_v26, %v756_v25  ;;  %v276_v12 = vshrl.u32 %v275_v11, 7 }
  0x4a   : > { %587 = vmatprep.mubr.f32.mxu1 %v1637_v0  ;;  %1430 = vmatpush3.bf16.msra.mxu0 %v1429_v4  ;;  %v789_v29 = vld [vmem:[#allocation2 + $0x1d8] sm:$0xff]  ;;  %v1469_v31 = vpack.c.bf16 %v771_v24, %v770_v22  ;;  %v740_v33 = vld [vmem:[#allocation2 + $0x50] sm:$0xff]  ;;  %v758_v38 = vld [vmem:[#allocation2 + $0xe0] sm:$0xff] }
  0x4b   : > { %1462 = vmatpush3.bf16.msra.mxu1 %v1461_v5  ;;  %1432 = vmatprep.subr.bf16.mxu0 %v1431_v6  ;;  %v741_v34 = vld [vmem:[#allocation2 + $0x58] sm:$0xff]  ;;  %v772_v35 = vld [vmem:[#allocation2 + $0x150] sm:$0xff]  ;;  %v1471_v36 = vpack.c.bf16 %v789_v29, %v788_v28  ;;  %v759_v39 = vld [vmem:[#allocation2 + $0xe8] sm:$0xff]  ;;  %v277_v13 = vsub.s32 0, %v276_v12  ;;  %v281_v15 = vsub.s32 1, %v276_v12  ;;  %v289_v16 = vsub.s32 3, %v276_v12 }
  0x4c   : > { %1207 = vmatmul.mubr.msk.f32.gmra.mrb[6].mxu0 %vm295_vm0, %v244_v1  ;;  %1464 = vmatprep.subr.bf16.mxu1 %v1463_v10  ;;  %v773_v37 = vld [vmem:[#allocation2 + $0x158] sm:$0xff]  ;;  %v247_v40 = vld [vmem:[%s1811_s11 + $0x30] sm:$0xff]  ;;  %v790_v41 = vld [vmem:[#allocation2 + $0x1e0] sm:$0xff]  ;;  %v1441_v43 = vpack.c.bf16 %v741_v34, %v740_v33  ;;  %v1443_v45 = vpack.c.bf16 %v759_v39, %v758_v38 }
  0x4d   : > { %1223 = vmatmul.mubr.msk.f32.gmra.mrb[6].mxu1 %vm295_vm0, %v244_v1  ;;  %432 = vmatprep.mubr.f32.mxu0 %v1637_v0  ;;  %v791_v42 = vld [vmem:[#allocation2 + $0x1e8] sm:$0xff]  ;;  %v1473_v44 = vpack.c.bf16 %v773_v37, %v772_v35  ;;  %v742_v46 = vld [vmem:[#allocation2 + $0x60] sm:$0xff]  ;;  %v760_v51 = vld [vmem:[#allocation2 + $0xf0] sm:$0xff] }
  0x4e   : > { %593 = vmatprep.mubr.f32.mxu1 %v1637_v0  ;;  %1434 = vmatpush3.bf16.msra.mxu0 %v1433_v17  ;;  %v743_v47 = vld [vmem:[#allocation2 + $0x68] sm:$0xff]  ;;  %v774_v48 = vld [vmem:[#allocation2 + $0x160] sm:$0xff]  ;;  %v1475_v49 = vpack.c.bf16 %v791_v42, %v790_v41  ;;  %v761_v52 = vld [vmem:[#allocation2 + $0xf8] sm:$0xff] }
  0x4f   : > { %1466 = vmatpush3.bf16.msra.mxu1 %v1465_v18  ;;  %1436 = vmatprep.subr.bf16.mxu0 %v1435_v19  ;;  %v775_v50 = vld [vmem:[#allocation2 + $0x168] sm:$0xff]  ;;  %v248_v53 = vld [vmem:[%s1811_s11 + $0x38] sm:$0xff]  ;;  %v1445_v54 = vpack.c.bf16 %v743_v47, %v742_v46  ;;  %v1447_v56 = vpack.c.bf16 %v761_v52, %v760_v51  ;;  %v744_v57 = vld [vmem:[#allocation2 + $0x70] sm:$0xff] }
  0x50   : > { %1208 = vmatmul.mubr.msk.f32.gmra.mrb[8].mxu0 %vm295_vm0, %v245_v14  ;;  %1468 = vmatprep.subr.bf16.mxu1 %v1467_v23  ;;  %v1477_v55 = vpack.c.bf16 %v775_v50, %v774_v48  ;;  %v745_v58 = vld [vmem:[#allocation2 + $0x78] sm:$0xff]  ;;  %v249_v59 = vld [vmem:[%s1811_s11 + $0x40] sm:$0xff]  ;;  %v250_v61 = vld [vmem:[%s1811_s11 + $0x48] sm:$0xff] }
  0x51   : > { %1224 = vmatmul.mubr.msk.f32.gmra.mrb[8].mxu1 %vm295_vm0, %v245_v14  ;;  %438 = vmatprep.mubr.f32.mxu0 %v1637_v0  ;;  %v1449_v60 = vpack.c.bf16 %v745_v58, %v744_v57  ;;  %v251_v62 = vld [vmem:[%s1811_s11 + $0x50] sm:$0xff]  ;;  %v252_v63 = vld [vmem:[%s1811_s11 + $0x58] sm:$0xff]  ;;  %v253_v1 = vld [vmem:[%s1811_s11 + $0x60] sm:$0xff] }
  0x52   : > { %599 = vmatprep.mubr.f32.mxu1 %v1637_v0  ;;  %1438 = vmatpush3.bf16.msra.mxu0 %v1437_v30  ;;  %v254_v2 = vld [vmem:[%s1811_s11 + $0x68] sm:$0xff]  ;;  %v255_v3 = vld [vmem:[%s1811_s11 + $0x70] sm:$0xff]  ;;  %v256_v4 = vld [vmem:[%s1811_s11 + $0x78] sm:$0xff]  ;;  %s1572_s11 = scalar_lea.vmem %s1571_s10, 4096 }
  0x53   : > { %1470 = vmatpush3.bf16.msra.mxu1 %v1469_v31  ;;  %1440 = vmatprep.subr.bf16.mxu0 %v1439_v32  ;;  %v792_v5 = vld [vmem:[#allocation2 + $0x1f0] sm:$0xff]  ;;  %v793_v6 = vld [vmem:[#allocation2 + $0x1f8] sm:$0xff]  ;;  %v273_v14 = vld [vmem:[%s2062_s2] sm:$0xf]  ;;  %p1574_p3 = scmp.lt.s32.totalorder %s1572_s11, %s1566_s22 }
  0x54   : > { %1209 = vmatmul.mubr.msk.f32.gmra.mrb[10].mxu0 %vm295_vm0, %v246_v27  ;;  %1472 = vmatprep.subr.bf16.mxu1 %v1471_v36  ;;  %v1479_v7 = vpack.c.bf16 %v793_v6, %v792_v5  ;;  %v776_v8 = vld [vmem:[#allocation2 + $0x170] sm:$0xff]  ;;  %v777_v9 = vld [vmem:[#allocation2 + $0x178] sm:$0xff]  ;;  %v1894_v17 = vrot.slane %v273_v14, %v277_v13  ;;  %v1898_v19 = vrot.slane %v273_v14, %v281_v15 }
  0x55   : > { %1225 = vmatmul.mubr.msk.f32.gmra.mrb[10].mxu1 %vm295_vm0, %v246_v27  ;;  %444 = vmatprep.mubr.f32.mxu0 %v1637_v0  ;;  %v1481_v10 = vpack.c.bf16 %v777_v9, %v776_v8  ;;  %v1900_v20 = vrot.slane %v273_v14, %v289_v16  ;;  %p1575_p4 = por %p1574_p3, %p1573_p2 }
  0x56   : > { %605 = vmatprep.mubr.f32.mxu1 %v1637_v0  ;;  %1442 = vmatpush3.bf16.msra.mxu0 %v1441_v43 }
  0x57   : > { %1474 = vmatpush3.bf16.msra.mxu1 %v1473_v44  ;;  %1444 = vmatprep.subr.bf16.mxu0 %v1443_v45  ;;  %p1576_p7 = pnand %p1575_p4, %p1569_p12 }
  0x58   : > { %1210 = vmatmul.mubr.msk.f32.gmra.mrb[12].mxu0 %vm295_vm0, %v247_v40  ;;  %1476 = vmatprep.subr.bf16.mxu1 %v1475_v49 }
  0x59   : > { %1226 = vmatmul.mubr.msk.f32.gmra.mrb[12].mxu1 %vm295_vm0, %v247_v40  ;;  %450 = vmatprep.mubr.f32.mxu0 %v1637_v0 }
  0x5a   : > { %611 = vmatprep.mubr.f32.mxu1 %v1637_v0  ;;  %1446 = vmatpush3.bf16.msra.mxu0 %v1445_v54 }
  0x5b   : > { %1478 = vmatpush3.bf16.msra.mxu1 %v1477_v55  ;;  %1448 = vmatprep.subr.bf16.mxu0 %v1447_v56 }
  0x5c   : > { %1211 = vmatmul.mubr.msk.f32.gmra.mrb[14].mxu0 %vm295_vm0, %v248_v53  ;;  %1480 = vmatprep.subr.bf16.mxu1 %v1479_v7 }
  0x5d   : > { %1227 = vmatmul.mubr.msk.f32.gmra.mrb[14].mxu1 %vm295_vm0, %v248_v53  ;;  %456 = vmatprep.mubr.f32.mxu0 %v1637_v0 }
  0x5e   : > { %617 = vmatprep.mubr.f32.mxu1 %v1637_v0  ;;  %1450 = vmatpush3.bf16.msra.mxu0 %v1449_v60 }
  0x5f   : > { %1482 = vmatpush3.bf16.msra.mxu1 %v1481_v10 }
  0x60   : > { %1212 = vmatmul.mubr.msk.f32.gmra.mrb[16].mxu0 %vm295_vm0, %v249_v59 }
  0x61   : > { %1228 = vmatmul.mubr.msk.f32.gmra.mrb[16].mxu1 %vm295_vm0, %v249_v59  ;;  %462 = vmatprep.mubr.f32.mxu0 %v1637_v0 }
  0x62   : > { %623 = vmatprep.mubr.f32.mxu1 %v1637_v0 }
  0x64   : > { %1213 = vmatmul.mubr.msk.f32.gmra.mrb[18].mxu0 %vm295_vm0, %v250_v61 }
  0x65   : > { %1229 = vmatmul.mubr.msk.f32.gmra.mrb[18].mxu1 %vm295_vm0, %v250_v61  ;;  %468 = vmatprep.mubr.f32.mxu0 %v1637_v0 }
  0x66   : > { %629 = vmatprep.mubr.f32.mxu1 %v1637_v0 }
  0x68   : > { %1214 = vmatmul.mubr.msk.f32.gmra.mrb[20].mxu0 %vm295_vm0, %v251_v62 }
  0x69   : > { %1230 = vmatmul.mubr.msk.f32.gmra.mrb[20].mxu1 %vm295_vm0, %v251_v62  ;;  %474 = vmatprep.mubr.f32.mxu0 %v1637_v0 }
  0x6a   : > { %635 = vmatprep.mubr.f32.mxu1 %v1637_v0 }
  0x6c   : > { %1215 = vmatmul.mubr.msk.f32.gmra.mrb[22].mxu0 %vm295_vm0, %v252_v63 }
  0x6d   : > { %1231 = vmatmul.mubr.msk.f32.gmra.mrb[22].mxu1 %vm295_vm0, %v252_v63  ;;  %480 = vmatprep.mubr.f32.mxu0 %v1637_v0 }
  0x6e   : > { %641 = vmatprep.mubr.f32.mxu1 %v1637_v0 }
  0x70   : > { %1216 = vmatmul.mubr.msk.f32.gmra.mrb[24].mxu0 %vm295_vm0, %v253_v1 }
  0x71   : > { %1232 = vmatmul.mubr.msk.f32.gmra.mrb[24].mxu1 %vm295_vm0, %v253_v1  ;;  %486 = vmatprep.mubr.f32.mxu0 %v1637_v0 }
  0x72   : > { %647 = vmatprep.mubr.f32.mxu1 %v1637_v0 }
  0x74   : > { %1217 = vmatmul.mubr.msk.f32.gmra.mrb[26].mxu0 %vm295_vm0, %v254_v2 }
  0x75   : > { %1233 = vmatmul.mubr.msk.f32.gmra.mrb[26].mxu1 %vm295_vm0, %v254_v2  ;;  %492 = vmatprep.mubr.f32.mxu0 %v1637_v0 }
  0x76   : > { %653 = vmatprep.mubr.f32.mxu1 %v1637_v0 }
  0x78   : > { %1218 = vmatmul.mubr.msk.f32.gmra.mrb[28].mxu0 %vm295_vm0, %v255_v3 }
  0x79   : > { %1234 = vmatmul.mubr.msk.f32.gmra.mrb[28].mxu1 %vm295_vm0, %v255_v3  ;;  %498 = vmatprep.mubr.f32.mxu0 %v1637_v0 }
  0x7a   : > { %659 = vmatprep.mubr.f32.mxu1 %v1637_v0  ;;  %v285_v0 = vsub.s32 2, %v276_v12 }
  0x7c   : > { %1219 = vmatmul.mubr.msk.f32.gmra.mrb[30].mxu0 %vm295_vm0, %v256_v4  ;;  %v1896_v18 = vrot.slane %v273_v14, %v285_v0 }
  0x7d   : > { %1235 = vmatmul.mubr.msk.f32.gmra.mrb[30].mxu1 %vm295_vm0, %v256_v4 }
 0x113   : > { %v410_v21 = vpop.f32.mrb[0].mxu0 }
 0x114   : > { %v411_v22 = vadd.f32 %v410_v21, %v1894_v17  ;;  %v571_v23 = vpop.f32.mrb[0].mxu1  ;;  %v412_v24 = vpop.f32.mrb[1].mxu0 }
 0x115   : > { %v572_v25 = vadd.f32 %v571_v23, %v1896_v18  ;;  %v413_v26 = vadd.f32 %v412_v24, %v1898_v19  ;;  %v573_v27 = vpop.f32.mrb[1].mxu1 }
 0x116   : > { %v574_v28 = vadd.f32 %v573_v27, %v1900_v20  ;;  %v666_v32 = vmax.f32 %v411_v22, 0.0 }
 0x117   : > { %v668_v29 = vmax.f32 %v572_v25, 0.0  ;;  %v667_v30 = vmax.f32 %v413_v26, 0.0  ;;  %v416_v31 = vpop.f32.mrb[2].mxu0 }
 0x118   : > { %v669_v33 = vmax.f32 %v574_v28, 0.0  ;;  %v417_v34 = vadd.f32 %v416_v31, %v1894_v17  ;;  %v577_v35 = vpop.f32.mrb[2].mxu1  ;;  %v418_v36 = vpop.f32.mrb[3].mxu0 }
 0x119   : > { %v578_v37 = vadd.f32 %v577_v35, %v1896_v18  ;;  %v419_v38 = vadd.f32 %v418_v36, %v1898_v19  ;;  %v579_v39 = vpop.f32.mrb[3].mxu1  ;;  %865 = vmatprep.mubr.f32.mxu0 %v667_v30 }
 0x11a   : > { %v580_v40 = vadd.f32 %v579_v39, %v1900_v20  ;;  %1010 = vmatprep.mubr.f32.mxu1 %v669_v33  ;;  %866 = vmatmul.mubr.f32.vlgmr.msra.gmra.mrb[32].mxu0 %v666_v32  ;;  %v670_v44 = vmax.f32 %v417_v34, 0.0 }
 0x11b   : > { %v672_v41 = vmax.f32 %v578_v37, 0.0  ;;  %v671_v42 = vmax.f32 %v419_v38, 0.0  ;;  %1011 = vmatmul.mubr.f32.vlgmr.msra.gmra.mrb[32].mxu1 %v668_v29  ;;  %v422_v43 = vpop.f32.mrb[4].mxu0 }
 0x11c   : > { %v673_v45 = vmax.f32 %v580_v40, 0.0  ;;  %v423_v46 = vadd.f32 %v422_v43, %v1894_v17  ;;  %v583_v47 = vpop.f32.mrb[4].mxu1  ;;  %v424_v48 = vpop.f32.mrb[5].mxu0 }
 0x11d   : > { %v584_v49 = vadd.f32 %v583_v47, %v1896_v18  ;;  %v425_v50 = vadd.f32 %v424_v48, %v1898_v19  ;;  %v585_v51 = vpop.f32.mrb[5].mxu1  ;;  %870 = vmatprep.mubr.f32.mxu0 %v671_v42 }
 0x11e   : > { %v586_v52 = vadd.f32 %v585_v51, %v1900_v20  ;;  %1015 = vmatprep.mubr.f32.mxu1 %v673_v45  ;;  %871 = vmatmul.mubr.f32.gmra.mrb[34].mxu0 %v670_v44  ;;  %v674_v56 = vmax.f32 %v423_v46, 0.0 }
 0x11f   : > { %v676_v53 = vmax.f32 %v584_v49, 0.0  ;;  %v675_v54 = vmax.f32 %v425_v50, 0.0  ;;  %1016 = vmatmul.mubr.f32.gmra.mrb[34].mxu1 %v672_v41  ;;  %v428_v55 = vpop.f32.mrb[6].mxu0 }
 0x120   : > { %v677_v57 = vmax.f32 %v586_v52, 0.0  ;;  %v429_v58 = vadd.f32 %v428_v55, %v1894_v17  ;;  %v589_v59 = vpop.f32.mrb[6].mxu1  ;;  %v430_v60 = vpop.f32.mrb[7].mxu0 }
 0x121   : > { %v590_v61 = vadd.f32 %v589_v59, %v1896_v18  ;;  %v431_v62 = vadd.f32 %v430_v60, %v1898_v19  ;;  %v591_v63 = vpop.f32.mrb[7].mxu1  ;;  %875 = vmatprep.mubr.f32.mxu0 %v675_v54 }
 0x122   : > { %v592_v1 = vadd.f32 %v591_v63, %v1900_v20  ;;  %1020 = vmatprep.mubr.f32.mxu1 %v677_v57  ;;  %876 = vmatmul.mubr.f32.gmra.mrb[36].mxu0 %v674_v56  ;;  %v678_v5 = vmax.f32 %v429_v58, 0.0 }
 0x123   : > { %v680_v2 = vmax.f32 %v590_v61, 0.0  ;;  %v679_v3 = vmax.f32 %v431_v62, 0.0  ;;  %1021 = vmatmul.mubr.f32.gmra.mrb[36].mxu1 %v676_v53  ;;  %v434_v4 = vpop.f32.mrb[8].mxu0 }
 0x124   : > { %v681_v6 = vmax.f32 %v592_v1, 0.0  ;;  %v435_v7 = vadd.f32 %v434_v4, %v1894_v17  ;;  %v595_v8 = vpop.f32.mrb[8].mxu1  ;;  %v436_v9 = vpop.f32.mrb[9].mxu0 }
 0x125   : > { %v596_v10 = vadd.f32 %v595_v8, %v1896_v18  ;;  %v437_v11 = vadd.f32 %v436_v9, %v1898_v19  ;;  %v597_v12 = vpop.f32.mrb[9].mxu1  ;;  %880 = vmatprep.mubr.f32.mxu0 %v679_v3 }
 0x126   : > { %v598_v13 = vadd.f32 %v597_v12, %v1900_v20  ;;  %1025 = vmatprep.mubr.f32.mxu1 %v681_v6  ;;  %881 = vmatmul.mubr.f32.gmra.mrb[38].mxu0 %v678_v5  ;;  %v682_v16 = vmax.f32 %v435_v7, 0.0 }
 0x127   : > { %v684_v14 = vmax.f32 %v596_v10, 0.0  ;;  %v683_v0 = vmax.f32 %v437_v11, 0.0  ;;  %1026 = vmatmul.mubr.f32.gmra.mrb[38].mxu1 %v680_v2  ;;  %v440_v15 = vpop.f32.mrb[10].mxu0 }
 0x128   : > { %v685_v21 = vmax.f32 %v598_v13, 0.0  ;;  %v441_v22 = vadd.f32 %v440_v15, %v1894_v17  ;;  %v601_v23 = vpop.f32.mrb[10].mxu1  ;;  %v442_v24 = vpop.f32.mrb[11].mxu0 }
 0x129   : > { %v602_v25 = vadd.f32 %v601_v23, %v1896_v18  ;;  %v443_v26 = vadd.f32 %v442_v24, %v1898_v19  ;;  %v603_v27 = vpop.f32.mrb[11].mxu1  ;;  %885 = vmatprep.mubr.f32.mxu0 %v683_v0 }
 0x12a   : > { %v604_v28 = vadd.f32 %v603_v27, %v1900_v20  ;;  %1030 = vmatprep.mubr.f32.mxu1 %v685_v21  ;;  %886 = vmatmul.mubr.f32.gmra.mrb[40].mxu0 %v682_v16  ;;  %v686_v32 = vmax.f32 %v441_v22, 0.0 }
 0x12b   : > { %v688_v29 = vmax.f32 %v602_v25, 0.0  ;;  %v687_v30 = vmax.f32 %v443_v26, 0.0  ;;  %1031 = vmatmul.mubr.f32.gmra.mrb[40].mxu1 %v684_v14  ;;  %v446_v31 = vpop.f32.mrb[12].mxu0 }
 0x12c   : > { %v689_v33 = vmax.f32 %v604_v28, 0.0  ;;  %v447_v34 = vadd.f32 %v446_v31, %v1894_v17  ;;  %v607_v35 = vpop.f32.mrb[12].mxu1  ;;  %v448_v36 = vpop.f32.mrb[13].mxu0 }
 0x12d   : > { %v608_v37 = vadd.f32 %v607_v35, %v1896_v18  ;;  %v449_v38 = vadd.f32 %v448_v36, %v1898_v19  ;;  %v609_v39 = vpop.f32.mrb[13].mxu1  ;;  %890 = vmatprep.mubr.f32.mxu0 %v687_v30 }
 0x12e   : > { %v610_v40 = vadd.f32 %v609_v39, %v1900_v20  ;;  %1035 = vmatprep.mubr.f32.mxu1 %v689_v33  ;;  %891 = vmatmul.mubr.f32.gmra.mrb[42].mxu0 %v686_v32  ;;  %v690_v44 = vmax.f32 %v447_v34, 0.0 }
 0x12f   : > { %v692_v41 = vmax.f32 %v608_v37, 0.0  ;;  %v691_v42 = vmax.f32 %v449_v38, 0.0  ;;  %1036 = vmatmul.mubr.f32.gmra.mrb[42].mxu1 %v688_v29  ;;  %v452_v43 = vpop.f32.mrb[14].mxu0 }
 0x130   : > { %v693_v45 = vmax.f32 %v610_v40, 0.0  ;;  %v453_v46 = vadd.f32 %v452_v43, %v1894_v17  ;;  %v613_v47 = vpop.f32.mrb[14].mxu1  ;;  %v454_v48 = vpop.f32.mrb[15].mxu0 }
 0x131   : > { %v614_v49 = vadd.f32 %v613_v47, %v1896_v18  ;;  %v455_v50 = vadd.f32 %v454_v48, %v1898_v19  ;;  %v615_v51 = vpop.f32.mrb[15].mxu1  ;;  %895 = vmatprep.mubr.f32.mxu0 %v691_v42 }
 0x132   : > { %v616_v52 = vadd.f32 %v615_v51, %v1900_v20  ;;  %1040 = vmatprep.mubr.f32.mxu1 %v693_v45  ;;  %896 = vmatmul.mubr.f32.gmra.mrb[44].mxu0 %v690_v44  ;;  %v694_v56 = vmax.f32 %v453_v46, 0.0 }
 0x133   : > { %v696_v53 = vmax.f32 %v614_v49, 0.0  ;;  %v695_v54 = vmax.f32 %v455_v50, 0.0  ;;  %1041 = vmatmul.mubr.f32.gmra.mrb[44].mxu1 %v692_v41  ;;  %v458_v55 = vpop.f32.mrb[16].mxu0 }
 0x134   : > { %v697_v57 = vmax.f32 %v616_v52, 0.0  ;;  %v459_v58 = vadd.f32 %v458_v55, %v1894_v17  ;;  %v619_v59 = vpop.f32.mrb[16].mxu1  ;;  %v460_v60 = vpop.f32.mrb[17].mxu0 }
 0x135   : > { %v620_v61 = vadd.f32 %v619_v59, %v1896_v18  ;;  %v461_v62 = vadd.f32 %v460_v60, %v1898_v19  ;;  %v621_v63 = vpop.f32.mrb[17].mxu1  ;;  %900 = vmatprep.mubr.f32.mxu0 %v695_v54 }
 0x136   : > { %v622_v1 = vadd.f32 %v621_v63, %v1900_v20  ;;  %1045 = vmatprep.mubr.f32.mxu1 %v697_v57  ;;  %901 = vmatmul.mubr.f32.gmra.mrb[46].mxu0 %v694_v56  ;;  %v698_v5 = vmax.f32 %v459_v58, 0.0 }
 0x137   : > { %v700_v2 = vmax.f32 %v620_v61, 0.0  ;;  %v699_v3 = vmax.f32 %v461_v62, 0.0  ;;  %1046 = vmatmul.mubr.f32.gmra.mrb[46].mxu1 %v696_v53  ;;  %v464_v4 = vpop.f32.mrb[18].mxu0 }
 0x138   : > { %v701_v6 = vmax.f32 %v622_v1, 0.0  ;;  %v465_v7 = vadd.f32 %v464_v4, %v1894_v17  ;;  %v625_v8 = vpop.f32.mrb[18].mxu1  ;;  %v466_v9 = vpop.f32.mrb[19].mxu0 }
 0x139   : > { %v626_v10 = vadd.f32 %v625_v8, %v1896_v18  ;;  %v467_v11 = vadd.f32 %v466_v9, %v1898_v19  ;;  %v627_v12 = vpop.f32.mrb[19].mxu1  ;;  %905 = vmatprep.mubr.f32.mxu0 %v699_v3 }
 0x13a   : > { %v628_v13 = vadd.f32 %v627_v12, %v1900_v20  ;;  %1050 = vmatprep.mubr.f32.mxu1 %v701_v6  ;;  %906 = vmatmul.mubr.f32.gmra.mrb[48].mxu0 %v698_v5  ;;  %v702_v16 = vmax.f32 %v465_v7, 0.0 }
 0x13b   : > { %v704_v14 = vmax.f32 %v626_v10, 0.0  ;;  %v703_v0 = vmax.f32 %v467_v11, 0.0  ;;  %1051 = vmatmul.mubr.f32.gmra.mrb[48].mxu1 %v700_v2  ;;  %v470_v15 = vpop.f32.mrb[20].mxu0 }
 0x13c   : > { %v705_v21 = vmax.f32 %v628_v13, 0.0  ;;  %v471_v22 = vadd.f32 %v470_v15, %v1894_v17  ;;  %v631_v23 = vpop.f32.mrb[20].mxu1  ;;  %v472_v24 = vpop.f32.mrb[21].mxu0 }
 0x13d   : > { %v632_v25 = vadd.f32 %v631_v23, %v1896_v18  ;;  %v473_v26 = vadd.f32 %v472_v24, %v1898_v19  ;;  %v633_v27 = vpop.f32.mrb[21].mxu1  ;;  %910 = vmatprep.mubr.f32.mxu0 %v703_v0 }
 0x13e   : > { %v634_v28 = vadd.f32 %v633_v27, %v1900_v20  ;;  %1055 = vmatprep.mubr.f32.mxu1 %v705_v21  ;;  %911 = vmatmul.mubr.f32.gmra.mrb[50].mxu0 %v702_v16  ;;  %v706_v32 = vmax.f32 %v471_v22, 0.0 }
 0x13f   : > { %v708_v29 = vmax.f32 %v632_v25, 0.0  ;;  %v707_v30 = vmax.f32 %v473_v26, 0.0  ;;  %1056 = vmatmul.mubr.f32.gmra.mrb[50].mxu1 %v704_v14  ;;  %v476_v31 = vpop.f32.mrb[22].mxu0 }
 0x140   : > { %v709_v33 = vmax.f32 %v634_v28, 0.0  ;;  %v477_v34 = vadd.f32 %v476_v31, %v1894_v17  ;;  %v637_v35 = vpop.f32.mrb[22].mxu1  ;;  %v478_v36 = vpop.f32.mrb[23].mxu0 }
 0x141   : > { %v638_v37 = vadd.f32 %v637_v35, %v1896_v18  ;;  %v479_v38 = vadd.f32 %v478_v36, %v1898_v19  ;;  %v639_v39 = vpop.f32.mrb[23].mxu1  ;;  %915 = vmatprep.mubr.f32.mxu0 %v707_v30 }
 0x142   : > { %v640_v40 = vadd.f32 %v639_v39, %v1900_v20  ;;  %1060 = vmatprep.mubr.f32.mxu1 %v709_v33  ;;  %916 = vmatmul.mubr.f32.gmra.mrb[52].mxu0 %v706_v32  ;;  %v710_v44 = vmax.f32 %v477_v34, 0.0 }
 0x143   : > { %v712_v41 = vmax.f32 %v638_v37, 0.0  ;;  %v711_v42 = vmax.f32 %v479_v38, 0.0  ;;  %1061 = vmatmul.mubr.f32.gmra.mrb[52].mxu1 %v708_v29  ;;  %v482_v43 = vpop.f32.mrb[24].mxu0 }
 0x144   : > { %v713_v45 = vmax.f32 %v640_v40, 0.0  ;;  %v483_v46 = vadd.f32 %v482_v43, %v1894_v17  ;;  %v643_v47 = vpop.f32.mrb[24].mxu1  ;;  %v484_v48 = vpop.f32.mrb[25].mxu0 }
 0x145   : > { %v644_v49 = vadd.f32 %v643_v47, %v1896_v18  ;;  %v485_v50 = vadd.f32 %v484_v48, %v1898_v19  ;;  %v645_v51 = vpop.f32.mrb[25].mxu1  ;;  %920 = vmatprep.mubr.f32.mxu0 %v711_v42 }
 0x146   : > { %v646_v52 = vadd.f32 %v645_v51, %v1900_v20  ;;  %1065 = vmatprep.mubr.f32.mxu1 %v713_v45  ;;  %921 = vmatmul.mubr.f32.gmra.mrb[54].mxu0 %v710_v44  ;;  %v714_v56 = vmax.f32 %v483_v46, 0.0 }
 0x147   : > { %v716_v53 = vmax.f32 %v644_v49, 0.0  ;;  %v715_v54 = vmax.f32 %v485_v50, 0.0  ;;  %1066 = vmatmul.mubr.f32.gmra.mrb[54].mxu1 %v712_v41  ;;  %v488_v55 = vpop.f32.mrb[26].mxu0 }
 0x148   : > { %v717_v57 = vmax.f32 %v646_v52, 0.0  ;;  %v489_v58 = vadd.f32 %v488_v55, %v1894_v17  ;;  %v649_v59 = vpop.f32.mrb[26].mxu1  ;;  %v490_v60 = vpop.f32.mrb[27].mxu0 }
 0x149   : > { %v650_v61 = vadd.f32 %v649_v59, %v1896_v18  ;;  %v491_v62 = vadd.f32 %v490_v60, %v1898_v19  ;;  %v651_v63 = vpop.f32.mrb[27].mxu1  ;;  %925 = vmatprep.mubr.f32.mxu0 %v715_v54 }
 0x14a   : > { %v652_v1 = vadd.f32 %v651_v63, %v1900_v20  ;;  %1070 = vmatprep.mubr.f32.mxu1 %v717_v57  ;;  %926 = vmatmul.mubr.f32.gmra.mrb[56].mxu0 %v714_v56  ;;  %v718_v5 = vmax.f32 %v489_v58, 0.0 }
 0x14b   : > { %v720_v2 = vmax.f32 %v650_v61, 0.0  ;;  %v719_v3 = vmax.f32 %v491_v62, 0.0  ;;  %1071 = vmatmul.mubr.f32.gmra.mrb[56].mxu1 %v716_v53  ;;  %v494_v4 = vpop.f32.mrb[28].mxu0 }
 0x14c   : > { %v721_v6 = vmax.f32 %v652_v1, 0.0  ;;  %v495_v7 = vadd.f32 %v494_v4, %v1894_v17  ;;  %v655_v8 = vpop.f32.mrb[28].mxu1  ;;  %v496_v9 = vpop.f32.mrb[29].mxu0 }
 0x14d   : > { %v656_v10 = vadd.f32 %v655_v8, %v1896_v18  ;;  %v497_v11 = vadd.f32 %v496_v9, %v1898_v19  ;;  %v657_v12 = vpop.f32.mrb[29].mxu1  ;;  %930 = vmatprep.mubr.f32.mxu0 %v719_v3 }
 0x14e   : > { %v658_v13 = vadd.f32 %v657_v12, %v1900_v20  ;;  %1075 = vmatprep.mubr.f32.mxu1 %v721_v6  ;;  %931 = vmatmul.mubr.f32.gmra.mrb[58].mxu0 %v718_v5  ;;  %v722_v16 = vmax.f32 %v495_v7, 0.0 }
 0x14f   : > { %v724_v14 = vmax.f32 %v656_v10, 0.0  ;;  %v723_v0 = vmax.f32 %v497_v11, 0.0  ;;  %1076 = vmatmul.mubr.f32.gmra.mrb[58].mxu1 %v720_v2  ;;  %v500_v15 = vpop.f32.mrb[30].mxu0 }
 0x150   : > { %v725_v21 = vmax.f32 %v658_v13, 0.0  ;;  %v501_v22 = vadd.f32 %v500_v15, %v1894_v17  ;;  %v661_v23 = vpop.f32.mrb[30].mxu1  ;;  %v502_v24 = vpop.f32.mrb[31].mxu0 }
 0x151   : > { %v662_v25 = vadd.f32 %v661_v23, %v1896_v18  ;;  %v503_v26 = vadd.f32 %v502_v24, %v1898_v19  ;;  %v663_v27 = vpop.f32.mrb[31].mxu1  ;;  %935 = vmatprep.mubr.f32.mxu0 %v723_v0  ;;  %v1970_v19 = vld [vmem:[%s2064_s4] ss:$0 sm:$0xff] }
 0x152   : > { %v664_v28 = vadd.f32 %v663_v27, %v1900_v20  ;;  %1080 = vmatprep.mubr.f32.mxu1 %v725_v21  ;;  %936 = vmatmul.mubr.f32.gmra.mrb[60].mxu0 %v722_v16  ;;  %v726_v31 = vmax.f32 %v501_v22, 0.0 }
 0x153   : > { %v728_v29 = vmax.f32 %v662_v25, 0.0  ;;  %v727_v30 = vmax.f32 %v503_v26, 0.0  ;;  %1081 = vmatmul.mubr.f32.gmra.mrb[60].mxu1 %v724_v14 }
 0x154   : > { %v729_v32 = vmax.f32 %v664_v28, 0.0 }
 0x155   : > { %940 = vmatprep.mubr.f32.mxu0 %v727_v30 }
 0x156   : > { %1085 = vmatprep.mubr.f32.mxu1 %v729_v32  ;;  %941 = vmatmul.mubr.f32.gmra.mrb[62].mxu0 %v726_v31 }
 0x157   : > { %1086 = vmatmul.mubr.f32.gmra.mrb[62].mxu1 %v728_v29 }
 0x1ed   : > { %v1275_v17 = vpop.f32.mrb[32].mxu0 }
 0x1ee   : > { %v1355_v18 = vpop.f32.mrb[32].mxu1  ;;  %v1276_v20 = vpop.f32.mrb[33].mxu0 }
 0x1ef   : > { %v1277_v33 = vadd.f32 %v1276_v20, %v1275_v17  ;;  %v1356_v34 = vpop.f32.mrb[33].mxu1 }
 0x1f0   : > { %v1357_v35 = vadd.f32 %v1356_v34, %v1355_v18 }
 0x1f1   : > { %v868_v36 = vadd.f32 %v1277_v33, %v1970_v19  ;;  %v1278_v37 = vpop.f32.mrb[34].mxu0 }
 0x1f2   : > { %v1358_v38 = vpop.f32.mrb[34].mxu1  ;;  %v1279_v39 = vpop.f32.mrb[35].mxu0 }
 0x1f3   : > { %v1013_v40 = vadd.f32 %v1357_v35, %v868_v36  ;;  %v1280_v41 = vadd.f32 %v1279_v39, %v1278_v37  ;;  %v1359_v42 = vpop.f32.mrb[35].mxu1 }
 0x1f4   : > { %v1360_v43 = vadd.f32 %v1359_v42, %v1358_v38 }
 0x1f5   : > { %1091 = vst [vmem:[%s1975_s6] sm:$0xff] %v1013_v40  ;;  %v873_v44 = vadd.f32 %v1280_v41, %v1970_v19  ;;  %v1281_v45 = vpop.f32.mrb[36].mxu0 }
 0x1f6   : > { %v1361_v46 = vpop.f32.mrb[36].mxu1  ;;  %v1282_v47 = vpop.f32.mrb[37].mxu0 }
 0x1f7   : > { %v1018_v48 = vadd.f32 %v1360_v43, %v873_v44  ;;  %v1283_v49 = vadd.f32 %v1282_v47, %v1281_v45  ;;  %v1362_v50 = vpop.f32.mrb[37].mxu1 }
 0x1f8   : > { %v1363_v51 = vadd.f32 %v1362_v50, %v1361_v46 }
 0x1f9   : > { %1092 = vst [vmem:[%s1975_s6 + $0x8] sm:$0xff] %v1018_v48  ;;  %v878_v52 = vadd.f32 %v1283_v49, %v1970_v19  ;;  %v1284_v53 = vpop.f32.mrb[38].mxu0 }
 0x1fa   : > { %v1364_v54 = vpop.f32.mrb[38].mxu1  ;;  %v1285_v55 = vpop.f32.mrb[39].mxu0 }
 0x1fb   : > { %v1023_v56 = vadd.f32 %v1363_v51, %v878_v52  ;;  %v1286_v57 = vadd.f32 %v1285_v55, %v1284_v53  ;;  %v1365_v58 = vpop.f32.mrb[39].mxu1 }
 0x1fc   : > { %v1366_v59 = vadd.f32 %v1365_v58, %v1364_v54 }
 0x1fd   : > { %1093 = vst [vmem:[%s1975_s6 + $0x10] sm:$0xff] %v1023_v56  ;;  %v883_v60 = vadd.f32 %v1286_v57, %v1970_v19  ;;  %v1287_v61 = vpop.f32.mrb[40].mxu0 }
 0x1fe   : > { %v1367_v62 = vpop.f32.mrb[40].mxu1  ;;  %v1288_v63 = vpop.f32.mrb[41].mxu0 }
 0x1ff   : > { %v1028_v1 = vadd.f32 %v1366_v59, %v883_v60  ;;  %v1289_v2 = vadd.f32 %v1288_v63, %v1287_v61  ;;  %v1368_v3 = vpop.f32.mrb[41].mxu1 }
 0x200   : > { %v1369_v4 = vadd.f32 %v1368_v3, %v1367_v62 }
 0x201   : > { %1094 = vst [vmem:[%s1975_s6 + $0x18] sm:$0xff] %v1028_v1  ;;  %v888_v5 = vadd.f32 %v1289_v2, %v1970_v19  ;;  %v1290_v6 = vpop.f32.mrb[42].mxu0 }
 0x202   : > { %v1370_v7 = vpop.f32.mrb[42].mxu1  ;;  %v1291_v8 = vpop.f32.mrb[43].mxu0 }
 0x203   : > { %v1033_v9 = vadd.f32 %v1369_v4, %v888_v5  ;;  %v1292_v10 = vadd.f32 %v1291_v8, %v1290_v6  ;;  %v1371_v11 = vpop.f32.mrb[43].mxu1 }
 0x204   : > { %v1372_v12 = vadd.f32 %v1371_v11, %v1370_v7 }
 0x205   : > { %1095 = vst [vmem:[%s1975_s6 + $0x20] sm:$0xff] %v1033_v9  ;;  %v893_v13 = vadd.f32 %v1292_v10, %v1970_v19  ;;  %v1293_v14 = vpop.f32.mrb[44].mxu0 }
 0x206   : > { %v1373_v0 = vpop.f32.mrb[44].mxu1  ;;  %v1294_v15 = vpop.f32.mrb[45].mxu0 }
 0x207   : > { %v1038_v16 = vadd.f32 %v1372_v12, %v893_v13  ;;  %v1295_v21 = vadd.f32 %v1294_v15, %v1293_v14  ;;  %v1374_v22 = vpop.f32.mrb[45].mxu1 }
 0x208   : > { %v1375_v23 = vadd.f32 %v1374_v22, %v1373_v0 }
 0x209   : > { %1096 = vst [vmem:[%s1975_s6 + $0x28] sm:$0xff] %v1038_v16  ;;  %v898_v24 = vadd.f32 %v1295_v21, %v1970_v19  ;;  %v1296_v25 = vpop.f32.mrb[46].mxu0 }
 0x20a   : > { %v1376_v26 = vpop.f32.mrb[46].mxu1  ;;  %v1297_v27 = vpop.f32.mrb[47].mxu0 }
 0x20b   : > { %v1043_v28 = vadd.f32 %v1375_v23, %v898_v24  ;;  %v1298_v29 = vadd.f32 %v1297_v27, %v1296_v25  ;;  %v1377_v30 = vpop.f32.mrb[47].mxu1 }
 0x20c   : > { %v1378_v31 = vadd.f32 %v1377_v30, %v1376_v26 }
 0x20d   : > { %1097 = vst [vmem:[%s1975_s6 + $0x30] sm:$0xff] %v1043_v28  ;;  %v903_v32 = vadd.f32 %v1298_v29, %v1970_v19  ;;  %v1299_v17 = vpop.f32.mrb[48].mxu0 }
 0x20e   : > { %v1379_v18 = vpop.f32.mrb[48].mxu1  ;;  %v1300_v20 = vpop.f32.mrb[49].mxu0 }
 0x20f   : > { %v1048_v33 = vadd.f32 %v1378_v31, %v903_v32  ;;  %v1301_v34 = vadd.f32 %v1300_v20, %v1299_v17  ;;  %v1380_v35 = vpop.f32.mrb[49].mxu1 }
 0x210   : > { %v1381_v36 = vadd.f32 %v1380_v35, %v1379_v18 }
 0x211   : > { %1098 = vst [vmem:[%s1975_s6 + $0x38] sm:$0xff] %v1048_v33  ;;  %v908_v37 = vadd.f32 %v1301_v34, %v1970_v19  ;;  %v1302_v38 = vpop.f32.mrb[50].mxu0 }
 0x212   : > { %v1382_v39 = vpop.f32.mrb[50].mxu1  ;;  %v1303_v40 = vpop.f32.mrb[51].mxu0 }
 0x213   : > { %v1053_v41 = vadd.f32 %v1381_v36, %v908_v37  ;;  %v1304_v42 = vadd.f32 %v1303_v40, %v1302_v38  ;;  %v1383_v43 = vpop.f32.mrb[51].mxu1 }
 0x214   : > { %v1384_v44 = vadd.f32 %v1383_v43, %v1382_v39 }
 0x215   : > { %1099 = vst [vmem:[%s1975_s6 + $0x40] sm:$0xff] %v1053_v41  ;;  %v913_v45 = vadd.f32 %v1304_v42, %v1970_v19  ;;  %v1305_v46 = vpop.f32.mrb[52].mxu0 }
 0x216   : > { %v1385_v47 = vpop.f32.mrb[52].mxu1  ;;  %v1306_v48 = vpop.f32.mrb[53].mxu0 }
 0x217   : > { %v1058_v49 = vadd.f32 %v1384_v44, %v913_v45  ;;  %v1307_v50 = vadd.f32 %v1306_v48, %v1305_v46  ;;  %v1386_v51 = vpop.f32.mrb[53].mxu1 }
 0x218   : > { %v1387_v52 = vadd.f32 %v1386_v51, %v1385_v47 }
 0x219   : > { %1100 = vst [vmem:[%s1975_s6 + $0x48] sm:$0xff] %v1058_v49  ;;  %v918_v53 = vadd.f32 %v1307_v50, %v1970_v19  ;;  %v1308_v54 = vpop.f32.mrb[54].mxu0 }
 0x21a   : > { %v1388_v55 = vpop.f32.mrb[54].mxu1  ;;  %v1309_v56 = vpop.f32.mrb[55].mxu0 }
 0x21b   : > { %v1063_v57 = vadd.f32 %v1387_v52, %v918_v53  ;;  %v1310_v58 = vadd.f32 %v1309_v56, %v1308_v54  ;;  %v1389_v59 = vpop.f32.mrb[55].mxu1 }
 0x21c   : > { %v1390_v60 = vadd.f32 %v1389_v59, %v1388_v55 }
 0x21d   : > { %1101 = vst [vmem:[%s1975_s6 + $0x50] sm:$0xff] %v1063_v57  ;;  %v923_v61 = vadd.f32 %v1310_v58, %v1970_v19  ;;  %v1311_v62 = vpop.f32.mrb[56].mxu0 }
 0x21e   : > { %v1391_v63 = vpop.f32.mrb[56].mxu1  ;;  %v1312_v1 = vpop.f32.mrb[57].mxu0 }
 0x21f   : > { %v1068_v2 = vadd.f32 %v1390_v60, %v923_v61  ;;  %v1313_v3 = vadd.f32 %v1312_v1, %v1311_v62  ;;  %v1392_v4 = vpop.f32.mrb[57].mxu1 }
 0x220   : > { %v1393_v5 = vadd.f32 %v1392_v4, %v1391_v63 }
 0x221   : > { %1102 = vst [vmem:[%s1975_s6 + $0x58] sm:$0xff] %v1068_v2  ;;  %v928_v6 = vadd.f32 %v1313_v3, %v1970_v19  ;;  %v1314_v7 = vpop.f32.mrb[58].mxu0 }
 0x222   : > { %v1394_v8 = vpop.f32.mrb[58].mxu1  ;;  %v1315_v9 = vpop.f32.mrb[59].mxu0 }
 0x223   : > { %v1073_v10 = vadd.f32 %v1393_v5, %v928_v6  ;;  %v1316_v11 = vadd.f32 %v1315_v9, %v1314_v7  ;;  %v1395_v12 = vpop.f32.mrb[59].mxu1 }
 0x224   : > { %v1396_v13 = vadd.f32 %v1395_v12, %v1394_v8 }
 0x225   : > { %1103 = vst [vmem:[%s1975_s6 + $0x60] sm:$0xff] %v1073_v10  ;;  %v933_v14 = vadd.f32 %v1316_v11, %v1970_v19  ;;  %v1317_v0 = vpop.f32.mrb[60].mxu0 }
 0x226   : > { %v1397_v15 = vpop.f32.mrb[60].mxu1  ;;  %v1318_v16 = vpop.f32.mrb[61].mxu0 }
 0x227   : > { %v1078_v21 = vadd.f32 %v1396_v13, %v933_v14  ;;  %v1319_v22 = vadd.f32 %v1318_v16, %v1317_v0  ;;  %v1398_v23 = vpop.f32.mrb[61].mxu1 }
 0x228   : > { %v1399_v24 = vadd.f32 %v1398_v23, %v1397_v15 }
 0x229   : > { %1104 = vst [vmem:[%s1975_s6 + $0x68] sm:$0xff] %v1078_v21  ;;  %v938_v25 = vadd.f32 %v1319_v22, %v1970_v19  ;;  %v1320_v26 = vpop.f32.mrb[62].mxu0 }
 0x22a   : > { %v1400_v27 = vpop.f32.mrb[62].mxu1  ;;  %v1321_v28 = vpop.f32.mrb[63].mxu0 }
 0x22b   : > { %v1083_v29 = vadd.f32 %v1399_v24, %v938_v25  ;;  %v1322_v30 = vadd.f32 %v1321_v28, %v1320_v26  ;;  %v1401_v31 = vpop.f32.mrb[63].mxu1 }
 0x22c   : > { %v1402_v32 = vadd.f32 %v1401_v31, %v1400_v27 }
 0x22d   : > { %1105 = vst [vmem:[%s1975_s6 + $0x70] sm:$0xff] %v1083_v29  ;;  %v943_v17 = vadd.f32 %v1322_v30, %v1970_v19 }
 0x22f   : > { %v1088_v18 = vadd.f32 %v1402_v32, %v943_v17 }
 0x231   : > { %1106 = vst [vmem:[%s1975_s6 + $0x78] sm:$0xff] %v1088_v18 }
 0x232   : > { %1579 = shalt.err (!%p1576_p7)
}
 0x233   : > { %s1580_s9 = scalar_lea.hbm %s2012_s7, 2048  ;;  %s1584_s14 = scalar_lea.hbm %s2065_s5, 6144 }
 0x234   : > { %p1581_p8 = scmp.ne.s32.totalorder %s2012_s7, %s1580_s9  ;;  %p1585_p1 = scmp.lt.u32.totalorder %s2012_s7, %s2065_s5 }
 0x235   : > { %p1586_p0 = scmp.lt.u32.totalorder %s1584_s14, %s1580_s9  ;;  %p1588_p6 = scmp.lt.u32.totalorder %s1580_s9, %s2012_s7 }
 0x236   : > { %p1582_p11 = pnand %p1581_p8, %p2076_p9 }
 0x237   : > { %p1587_p5 = por %p1586_p0, %p1585_p1 }
 0x238   : > { %p1583_p13 = pneg %p1582_p11 }
 0x239   : > { %p1589_p10 = por %p1588_p6, %p1587_p5 }
 0x23b   : > { %p1590_p12 = pnand %p1589_p10, %p1583_p13 }
 0x23d   : > { %1593 = shalt.err (!%p1590_p12)
}
 0x23e   : > { %s1639_s6 = smov 128   ;;  %s1640_s17 = smov 8  }
 0x23f   : > { %1487 = dma.vmem_to_hbm [thread:$0]  (%p2076_p9), %s2014_s23, 2048, %s2012_s7, %s2019_s8, %s1639_s6, %s1639_s6, %s1640_s17  }
 0x240 PF: > { %p1499_p2 = scmp.ge.s32.totalorder %s1632_s21, 2  ;;  %s1136_s25 = sand.u32 1, %s1620_s18  }
 0x241   : > { %p2077_p3 = scmp.ne.s32.totalorder %s2070_s29, 0  ;;  %s1137_s26 = scalar_lea.sflag [#allocation4], %s1136_s25 }
 0x243   : > { %p1494_p4 = pnand %p1499_p2, %p2077_p3 }
 0x245   : > { %1615 = dma.done.wait (!%p1494_p4), %s1137_s26, 2048  }
 0x246   : > { %1617 = vsyncadd (!%p1494_p4), %s1137_s26, 4294965248  ;;  %p16_p7 = scmp.ge.s32.totalorder %s1696_s24, 5   ;;  %s2078_s18 = smov %s1624_s19 }
 0x247   : > { %s2079_s19 = smov %s1628_s20  ;;  %s2080_s20 = smov %s1707_s27 }
 0x248   : > { %s2081_s21 = smov %s1696_s24  ;;  %18 = sbr.rel (!%p16_p7) target bundleno = 4 (0x4), region = 80 }
 0x24f   :  { %1142 = vsyncpa [#allocation3], 1 }
 0x250   :  { %1144 = vsyncpa [#allocation3 + $0x1], 1 }
 0x251   :  { %1145 = vsyncpa [#allocation4], 1 }
 0x252   :  { %1147 = vsyncpa [#allocation4 + $0x1], 1 }

</bundles_post_ra>
